<compile_context>
chip_gen: v6e
topology: v6e:2x2x1
jax: 0.10.0
libtpu: 0.0.40
codegen_flags: <defaults>
</compile_context>

<pallas_src>
import math

import jax
import jax.numpy as jnp
from jax.experimental import pallas as pl
from jax.experimental.pallas import tpu as pltpu


# --------------------------------------------------------------------------- helpers
def _round_up(x, m):
    return ((x + m - 1) // m) * m


def _round_down(x, m):
    return (x // m) * m


def _sublane_multiple(dtype):
    # sublane packing: f32 -> 8, bf16 -> 16, int8/fp8 -> 32
    return {4: 8, 2: 16, 1: 32}.get(jnp.dtype(dtype).itemsize, 8)


def _padded_tile_bytes(rows, cols, dtype):
    """True VMEM footprint of a (rows, cols) tile incl. (sublane, lane) padding."""
    sub = _sublane_multiple(dtype)
    return _round_up(max(rows, 1), sub) * _round_up(max(cols, 1), 128) * jnp.dtype(dtype).itemsize


def _vmem_budget_bytes():
    """Generation-aware scoped-VMEM cap (~55% of physical; conservative fallback)."""
    try:
        cap = int(pltpu.get_tpu_info().vmem_capacity_bytes)
    except Exception:
        cap = 64 << 20  # v7x-sized fallback (smallest current part)
    return max(16 << 20, int(cap * 0.55))


def _choose_packing(d_mark, d_model, dtype, *, max_weight_bytes=4 << 20):
    """Lane-packing factor G such that G*d_model is a multiple of 128 (lane-dense vst)."""
    if d_model % 128 == 0:
        return 1
    g = 128 // math.gcd(d_model, 128)
    # Don't pack if the block-diagonal weight would eat too much VMEM.
    if _padded_tile_bytes(g * d_mark, g * d_model, dtype) > max_weight_bytes:
        return 1
    return g


def pack_time_embedding_weight(weight_t):
    """Precompute (ONCE, next to the weight) the lane-packed kernel weight.

    weight_t: (d_mark, d_model) = transpose of torch's (d_model, d_mark) weight.
    Returns (w_packed, G); w_packed = kron(I_G, weight_t) with shape (G*d_mark, G*d_model).
    Hoist this out of the forward pass so the pallas_call is the only per-step work.
    """
    d_mark, d_model = weight_t.shape
    g = _choose_packing(d_mark, d_model, weight_t.dtype)
    if g > 1:
        w = jnp.kron(jnp.eye(g, dtype=weight_t.dtype), weight_t)
    else:
        w = weight_t
    return w, g


# --------------------------------------------------------------------------- kernel
def _time_embed_kernel(x_ref, w_ref, o_ref):
    # x_ref: (tile_rows, in_cols) packed input rows
    # w_ref: (in_cols, out_cols) (block-diagonal) weight, resident across steps
    # o_ref: (tile_rows, out_cols) lane-dense output tile
    o_ref[...] = jnp.dot(
        x_ref[...], w_ref[...], preferred_element_type=jnp.float32
    ).astype(o_ref.dtype)


# --------------------------------------------------------------------------- wrapper
def time_embedding(x, weight_t, *, packed=None, tile_rows=None, target_out_bytes=2 << 20):
    """Linear embedding without bias (Pallas TPU).

    x:        (batch, seq, d_mark)
    weight_t: (d_mark, d_model)  (transpose of torch's (d_model, d_mark) weight)
    packed:   optional result of pack_time_embedding_weight(weight_t) (hoisted)
    returns   (batch, seq, d_model), same dtype as x
    """
    b, s, d_mark = x.shape
    d_mark_w, d_model = weight_t.shape
    assert d_mark == d_mark_w

    if packed is None:  # convenience path; prefer precomputing with pack_time_embedding_weight
        packed = pack_time_embedding_weight(weight_t)
    w_in, G = packed

    m = b * s
    m_pad = _round_up(m, G)
    in_cols = G * d_mark
    out_cols = G * d_model

    x2d = x.reshape(m, d_mark)
    if m_pad != m:
        # One-time pad so the (free, contiguous) packing reshape exists.  Cheaper
        # than losing lane-dense stores on every grid step.
        x2d = jnp.pad(x2d, ((0, m_pad - m), (0, 0)))
    m_rows = m_pad // G
    x2d = x2d.reshape(m_rows, in_cols)

    itemsize = jnp.dtype(x.dtype).itemsize
    sub = _sublane_multiple(x.dtype)
    budget = _vmem_budget_bytes()
    headroom = 4 << 20

    # ---- tile sizing: key on OUTPUT bytes (~target_out_bytes per step, >=512 rows)
    if tile_rows is None:
        tr = max(512, target_out_bytes // max(1, out_cols * itemsize))
        tr = max(sub, _round_down(tr, sub))
    else:
        tr = max(1, int(tile_rows))

    if tr >= m_rows:
        if m_rows > sub:
            # Keep >= 2 grid steps so the "parallel" M axis can split across
            # v7x's two TensorCores (negligible overhead on 1-TC parts).
            tr = _round_up(pl.cdiv(m_rows, 2), sub)
        else:
            tr = m_rows  # single full-extent block (legal)

    # ---- shrink tile until the (lane/sublane-padded) footprint fits the budget
    def _footprint(rows):
        return (2 * _padded_tile_bytes(rows, in_cols, x.dtype)       # double-buffered input
                + 2 * _padded_tile_bytes(rows, out_cols, x.dtype)    # double-buffered output
                + 2 * _padded_tile_bytes(in_cols, out_cols, w_in.dtype))  # weight buffers

    while _footprint(tr) > budget - headroom and tr > sub:
        tr = max(sub, _round_down(tr // 2, sub))

    # Legality: block second-to-last dim must be a multiple of 8 or the full extent.
    if tr < m_rows and tr % 8 != 0:
        tr = _round_up(tr, 8)
        if tr >= m_rows:
            tr = m_rows

    vmem_limit = int(max(16 << 20, min(budget, _footprint(tr) + headroom)))
    grid = (pl.cdiv(m_rows, tr),)

    out = pl.pallas_call(
        _time_embed_kernel,
        out_shape=jax.ShapeDtypeStruct((m_rows, out_cols), x.dtype),
        grid_spec=pltpu.PrefetchScalarGridSpec(
            num_scalar_prefetch=0,
            grid=grid,
            in_specs=[
                # tile of packed input rows (ragged last block masked by Pallas)
                pl.BlockSpec((tr, in_cols), lambda i: (i, 0)),
                # full (block-diagonal) weight, same block every step -> resident
                pl.BlockSpec((in_cols, out_cols), lambda i: (0, 0)),
            ],
            out_specs=pl.BlockSpec((tr, out_cols), lambda i: (i, 0)),
        ),
        compiler_params=pltpu.CompilerParams(
            dimension_semantics=("parallel",),   # M axis: embarrassingly parallel
            vmem_limit_bytes=vmem_limit,
        ),
    )(x2d, w_in)

    out = out.reshape(m_pad, d_model)
    if m_pad != m:
        out = out[:m]
    return out.reshape(b, s, d_model)


# --------------------------------------------------------------------------- self-test
def _ref(x, w_torch):
    # Pure-JAX reference == torch's x @ weight.T for weight (d_model, d_mark).
    return jnp.einsum(
        "bsd,md->bsm", x.astype(jnp.float32), w_torch.astype(jnp.float32)
    )


if __name__ == "__main__":
    key = jax.random.PRNGKey(0)
    ks = jax.random.split(key, 10)

    # --- primary shapes (time marks -> model dim); hoisted packed weight (G=4).
    b, s, d_mark, d_model = 2, 8, 4, 32
    x = jax.random.normal(ks[0], (b, s, d_mark), dtype=jnp.float32)
    bound = 1.0 / math.sqrt(d_mark)
    w_torch = jax.random.uniform(ks[1], (d_model, d_mark), jnp.float32, -bound, bound)
    packed = pack_time_embedding_weight(w_torch.T)   # precomputed once, out of hot path
    out = time_embedding(x, w_torch.T, packed=packed)
    jax.block_until_ready(out)
    assert out.shape == (b, s, d_model)
    assert jnp.allclose(out, _ref(x, w_torch), atol=1e-5, rtol=1e-5)

    # --- G == 1 path (d_model multiple of 128), ragged multi-block grid.
    b2, s2, dm2, dmod2 = 3, 25, 5, 256
    x2 = jax.random.normal(ks[2], (b2, s2, dm2), dtype=jnp.float32)
    w2 = jax.random.uniform(ks[3], (dmod2, dm2), jnp.float32, -1.0, 1.0)
    out2 = time_embedding(x2, w2.T, tile_rows=16)    # grid = cdiv(75,16) = 5, ragged
    jax.block_until_ready(out2)
    assert jnp.allclose(out2, _ref(x2, w2), atol=1e-5, rtol=1e-5)

    # --- generalized packing: d_model=24 -> G=16, with M padding (75 -> 80).
    b3, s3, dm3, dmod3 = 3, 25, 5, 24
    x3 = jax.random.normal(ks[4], (b3, s3, dm3), dtype=jnp.float32)
    w3 = jax.random.uniform(ks[5], (dmod3, dm3), jnp.float32, -1.0, 1.0)
    out3 = time_embedding(x3, w3.T)
    jax.block_until_ready(out3)
    assert jnp.allclose(out3, _ref(x3, w3), atol=1e-5, rtol=1e-5)

    # --- packed path (G=4), ragged multi-block grid + default two-step split.
    b4, s4, dm4, dmod4 = 4, 19, 4, 32                # m = 76, G = 4, m_rows = 19
    x4 = jax.random.normal(ks[6], (b4, s4, dm4), dtype=jnp.float32)
    w4 = jax.random.uniform(ks[7], (dmod4, dm4), jnp.float32, -1.0, 1.0)
    out4a = time_embedding(x4, w4.T, tile_rows=8)    # grid = 3, ragged last block
    out4b = time_embedding(x4, w4.T)                 # heuristic: >= 2 steps (TC split)
    jax.block_until_ready((out4a, out4b))
    assert jnp.allclose(out4a, _ref(x4, w4), atol=1e-5, rtol=1e-5)
    assert jnp.allclose(out4b, _ref(x4, w4), atol=1e-5, rtol=1e-5)

    # --- bf16 path (halves HBM traffic when the surrounding model runs bf16).
    x5 = x.astype(jnp.bfloat16)
    w5 = w_torch.astype(jnp.bfloat16)
    out5 = time_embedding(x5, w5.T)
    jax.block_until_ready(out5)
    assert out5.dtype == jnp.bfloat16
    assert jnp.allclose(out5.astype(jnp.float32), _ref(x5, w5), atol=5e-2, rtol=5e-2)

    print("KERNEL_OK")
</pallas_src>

<mosaic_0001>
module attributes {stable_mosaic.version = 11 : i64} {
  func.func @_time_embed_kernel(%arg0: i32, %arg1: memref<4x16xf32, #tpu.memory_space<vmem>>, %arg2: memref<16x128xf32, #tpu.memory_space<vmem>>, %arg3: memref<4x128xf32, #tpu.memory_space<vmem>>) attributes {dimension_semantics = [#tpu.dimension_semantics<parallel>], iteration_bounds = array<i64: 1>, scalar_prefetch = 0 : i64, scratch_operands = 0 : i64, tpu.core_type = #tpu.core_type<tc>, window_params = [{transform_indices = @transform_0, window_bounds = array<i64: 4, 16>}, {pipeline_mode = #tpu.pipeline_mode<synchronous>, transform_indices = @transform_1, window_bounds = array<i64: 16, 128>}, {transform_indices = @transform_2, window_bounds = array<i64: 4, 128>}]} {
    %c0 = arith.constant 0 : index
    %c0_0 = arith.constant 0 : index
    %0 = vector.load %arg1[%c0, %c0_0] : memref<4x16xf32, #tpu.memory_space<vmem>>, vector<4x16xf32>
    %c0_1 = arith.constant 0 : index
    %c0_2 = arith.constant 0 : index
    %1 = vector.load %arg2[%c0_1, %c0_2] : memref<16x128xf32, #tpu.memory_space<vmem>>, vector<16x128xf32>
    %cst = arith.constant dense<0.000000e+00> : vector<4x128xf32>
    %2 = tpu.matmul %0, %1, %cst {dimension_numbers = #tpu.dot_dimension_numbers<[1], [0], [0], [1], [0, 0, 1, 1], [], []>} : vector<4x16xf32>, vector<16x128xf32>, vector<4x128xf32> -> vector<4x128xf32>
    %c0_3 = arith.constant 0 : index
    %c0_4 = arith.constant 0 : index
    %3 = vector.load %arg3[%c0_3, %c0_4] : memref<4x128xf32, #tpu.memory_space<vmem>>, vector<4x128xf32>
    tpu.vector_store %arg3[%c0_3, %c0_4], %2 {strides = array<i32>} : memref<4x128xf32, #tpu.memory_space<vmem>>, vector<4x128xf32>,
    return
  }
  func.func @transform_0(%arg0: i32) -> (i32, i32) {
    %c0_i32 = arith.constant 0 : i32
    %c0_i32_0 = arith.constant 0 : i32
    return %arg0, %c0_i32 : i32, i32
  }
  func.func @transform_1(%arg0: i32) -> (i32, i32) {
    %c0_i32 = arith.constant 0 : i32
    %c0_i32_0 = arith.constant 0 : i32
    %c0_i32_1 = arith.constant 0 : i32
    return %c0_i32, %c0_i32_0 : i32, i32
  }
  func.func @transform_2(%arg0: i32) -> (i32, i32) {
    %c0_i32 = arith.constant 0 : i32
    %c0_i32_0 = arith.constant 0 : i32
    return %arg0, %c0_i32 : i32, i32
  }
}

</mosaic_0001>

<bundles_post_ra>
// kernel: tpu_custom_call.1
= control target key start
LH: loop header
LB: loop body
LE: loop exit
PB: predicated region body
PF: predicated region fallthrough
CT: control target
= control target key end

     0   :  { %7 = vsyncpa [#allocation3], 0  ;;  %s247_s0 = inlined_call_operand.hbm [shape: f32[4,16], index: 0, kind: input, shape index: {}]   ;;  %s248_s1 = inlined_call_operand.hbm [shape: f32[16,128], index: 1, kind: input, shape index: {}]   ;;  %s249_s2 = inlined_call_operand.hbm [shape: f32[4,128], index: 2, kind: output, shape index: {}]  }
   0x1   :  { %8 = vsyncpa [#allocation6], 0 }
   0x2   :  { %9 = vsyncpa [#allocation4], 0  ;;  %s216_s9 = smov [#allocation2]   ;;  %s217_s11 = smov [#allocation5]  }
   0x3   :  { %s16_s10 = sshll.u32 %s216_s9, 4  ;;  %s25_s12 = sshll.u32 %s217_s11, 4  ;;  %s17_s10 = int_to_ptr.vmem [resolvable:$true] %s16_s10  ;;  %s26_s12 = int_to_ptr.vmem [resolvable:$true] %s25_s12 }
   0x4   :  { %s158_s13 = scalar_lea.vmem %s17_s10, 64  ;;  %p163_p1 = scmp.lt.s32.totalorder %s17_s10, %s17_s10 }
   0x5   :  { %p159_p0 = scmp.ne.s32.totalorder %s17_s10, %s158_s13  ;;  %p164_p2 = scmp.lt.s32.totalorder %s158_s13, %s158_s13 }
   0x7   :  { %p165_p3 = por %p164_p2, %p163_p1 }
   0x9   :  { %p166_p4 = pnand %p165_p3, %p159_p0 }
   0xb   :  { %169 = shalt.err (!%p166_p4)
}
   0xc   :  { %19 = dma.hbm_to_vmem [thread:$0]  %s247_s0, 64, %s17_s10, [#allocation3]  }
   0xd   :  { %s178_s16 = scalar_lea.vmem %s26_s12, 256  ;;  %p183_p6 = scmp.lt.s32.totalorder %s26_s12, %s26_s12 }
   0xe   :  { %p179_p5 = scmp.ne.s32.totalorder %s26_s12, %s178_s16  ;;  %p184_p7 = scmp.lt.s32.totalorder %s178_s16, %s178_s16 }
  0x10   :  { %p185_p8 = por %p184_p7, %p183_p6 }
  0x12   :  { %p186_p9 = pnand %p185_p8, %p179_p5 }
  0x14   :  { %189 = shalt.err (!%p186_p9)
}
  0x15   :  { %s218_s17 = smov 128   ;;  %s219_s18 = smov 8  }
  0x16   :  { %31 = dma.hbm_to_vmem [thread:$0]  %s248_s1, 256, %s26_s12, [#allocation6], %s218_s17, %s218_s17, %s219_s18  }
  0x17   :  { %210 = dma.done.wait [#allocation3], 64  }
  0x18   :  { %211 = vsyncadd [#allocation3], 4294967232 }
  0x19   :  { %212 = dma.done.wait [#allocation6], 256  }
  0x1a   :  { %213 = vsyncadd [#allocation6], 4294967040  ;;  %v220_v0 = vmov 0.0   ;;  %vm221_vm0 = vmmov 0   ;;  %v40_v1 = vld [vmem:[#allocation5 + $0x8] sm:$0xff]  ;;  %v39_v2 = vld [vmem:[#allocation5] sm:$0xff] }
  0x1b   :  { %136 = vmatprep.subr.mxu0 %v220_v0  ;;  %140 = vmatprep.mubr.msk.f32.mxu0 %vm221_vm0, %v220_v0  ;;  %v38_v3 = vld [vmem:[#allocation2] sm:$0xf]  ;;  %vm41_vm1 = vcmask 130048   ;;  %s222_s0 = smov [#allocation7]  }
  0x1c   :  { %137 = vmatpush3.msra.mxu0 %v40_v1  ;;  %s122_s21 = sshll.u32 %s222_s0, 4  ;;  %s123_s21 = int_to_ptr.vmem [resolvable:$true] %s122_s21 }
  0x1d   :  { %138 = vmatprep.subr.mxu0 %v220_v0  ;;  %s190_s1 = scalar_lea.vmem %s123_s21, 64  ;;  %p195_p11 = scmp.lt.s32.totalorder %s123_s21, %s123_s21 }
  0x1e   :  { %139 = vmatpush3.msra.mxu0 %v39_v2  ;;  %p191_p10 = scmp.ne.s32.totalorder %s123_s21, %s190_s1  ;;  %p196_p12 = scmp.lt.s32.totalorder %s190_s1, %s190_s1 }
  0x1f   :  { %141 = vmatmul.mubr.msk.f32.vlgmr.msra.gmra.mxu0 %vm41_vm1, %v38_v3 }
  0x20   :  { %p197_p13 = por %p196_p12, %p195_p11 }
  0x22   :  { %p198_p0 = pnand %p197_p13, %p191_p10 }
  0xdf   :  { %v111_v4 = vpop.f32.mrf.mxu0 }
  0xe0   :  { %115 = vst [vmem:[#allocation7] sm:$0xf] %v111_v4 }
  0xe1   :  { %v142_v5 = vpop.f32.mrf.mxu0 }
  0xe2   :  { %201 = shalt.err (!%p198_p0)
}
  0xe3   :  { %125 = dma.vmem_to_hbm [thread:$0]  %s123_s21, 64, %s249_s2, [#allocation4]  }
  0xe4   :  { %214 = dma.done.wait [#allocation4], 64  }
  0xe5   :  { %215 = vsyncadd [#allocation4], 4294967232 }
  0xe6   :  { %129 = vsyncpa [#allocation3], 1 }
  0xe7   :  { %130 = vsyncpa [#allocation6], 1 }
  0xe8   :  { %131 = vsyncpa [#allocation4], 1 }

</bundles_post_ra>
